<compile_context>
chip_gen: v6e
topology: v6e:2x2x1
jax: 0.10.0
libtpu: 0.0.40
codegen_flags: <defaults>
</compile_context>

<pallas_src>
import jax
import jax.numpy as jnp
from jax.experimental import pallas as pl
from jax.experimental.pallas import tpu as pltpu

T = 2.0                  # temperature (self.T)
EPSILON = 0.1            # sinkhorn_loss epsilon
INV_EPSILON = 1.0 / EPSILON
N_SINKHORN_ITERS = 20    # sinkhorn_loss n_iters
N_EXACT_ITERS = 2        # final iterations use exact division
LOSS_SCALE = 0.0008      # 0.0008 * sinkhorn_loss(...)
C_CHUNK = 8              # class-dim chunk for the cdist accumulation (sublane-sized)
REP_LANES = 128          # lane replication width for the Sinkhorn u/v vectors
VMEM_LIMIT_BYTES = 32 * 1024 * 1024   # raises v5e's 16 MiB default; <= v6e/v7x defaults


def _softmax_rows(x):
    # softmax over axis=1 (classes), numerically stabilized; reciprocal of the
    # [rows, 1] sum + broadcast multiply (no full-matrix divide).
    x = x - jnp.max(x, axis=1, keepdims=True)
    e = jnp.exp(x)
    return e * (1.0 / jnp.sum(e, axis=1, keepdims=True))


def cdist_kernel(ys_ref, yt_ref, w_ref):
    """W[i, j] = sum_c |softmax(ys/T)[i, c] - softmax(yt/T)[j, c]|  (torch.cdist p=1)."""
    p_s = _softmax_rows(ys_ref[...].astype(jnp.float32) * (1.0 / T))   # [TN, C]
    p_t = _softmax_rows(yt_ref[...].astype(jnp.float32) * (1.0 / T))   # [TM, C]
    p_t_t = p_t.T                                                      # [C, TM] (M on lanes)

    tn, c = p_s.shape
    tm = p_t.shape[0]
    acc = jnp.zeros((tn, tm), jnp.float32)
    # Accumulate the L1 distance C_CHUNK classes at a time; the broadcast temp
    # is only [TN, C_CHUNK, TM] (target index lane-dense), never [N, M, C].
    for c0 in range(0, c, C_CHUNK):
        cc = min(C_CHUNK, c - c0)
        d = jnp.abs(p_s[:, c0:c0 + cc, None] - p_t_t[None, c0:c0 + cc, :])  # [TN, cc, TM]
        acc = acc + jnp.sum(d, axis=1)
    w_ref[...] = acc


def _recip(x, exact):
    if exact:
        return 1.0 / x
    # EUP vrcp (separate bundle slot) + one Newton step -> ~exact f32 quality
    # without putting a divide chain on the serial critical path.
    r = pl.reciprocal(x, approx=True)
    return r * (2.0 - x * r)


def sinkhorn_kernel(w_ref, out_ref):
    W = w_ref[...]                               # [N, M] f32
    K = jnp.exp(W * (-INV_EPSILON))              # EUP exp
    K_t = K.T                                    # one-time XLU transpose (reused 20x)
    n, m = W.shape

    # diag(U) K diag(V) with V_0 = 1 and U updated first is algebraically
    # identical to the reference's alternating row (dim=1) / col (dim=0)
    # normalization of K.  U/V are lane-replicated so the matvecs are plain
    # lane-dense MXU matmuls.
    U = jnp.ones((n, REP_LANES), jnp.float32)
    V = jnp.ones((m, REP_LANES), jnp.float32)
    for it in range(N_SINKHORN_ITERS):           # fully unrolled fixed trip count
        exact = it >= N_SINKHORN_ITERS - N_EXACT_ITERS
        su = jnp.dot(K, V, preferred_element_type=jnp.float32)     # [N, 128] = K v
        U = _recip(su, exact)
        sv = jnp.dot(K_t, U, preferred_element_type=jnp.float32)   # [M, 128] = K^T u
        V = _recip(sv, exact)

    # loss = sum(P * W), P = diag(u) K diag(v):  sum_i u_i * sum_j (K*W)_ij v_j
    t = jnp.dot(K * W, V, preferred_element_type=jnp.float32)      # [N, 128]
    out_ref[0, 0] = LOSS_SCALE * jnp.sum(U[:, :1] * t[:, :1])


def sinkhorn_loss(y_s, y_t, *, block_n=128, block_m=128):
    """Pallas implementation of Sinkhorn.forward(y_s, y_t) -> scalar loss."""
    n, c = y_s.shape
    m, c2 = y_t.shape
    assert c == c2, "y_s and y_t must have the same number of classes"
    tn = min(block_n, n)
    tm = min(block_m, m)

    # Stage 1: tiled softmax + cdist -> W [N, M] (lane-dense in M).
    w = pl.pallas_call(
        cdist_kernel,
        out_shape=jax.ShapeDtypeStruct((n, m), jnp.float32),
        grid=(pl.cdiv(n, tn), pl.cdiv(m, tm)),
        in_specs=[
            pl.BlockSpec((tn, c), lambda i, j: (i, 0)),
            pl.BlockSpec((tm, c), lambda i, j: (j, 0)),
        ],
        out_specs=pl.BlockSpec((tn, tm), lambda i, j: (i, j)),
        compiler_params=pltpu.CompilerParams(
            dimension_semantics=("parallel", "parallel"),   # megacore on v7x
            vmem_limit_bytes=VMEM_LIMIT_BYTES,
        ),
    )(y_s, y_t)

    # Stage 2: Sinkhorn fixed point on the full K (must be VMEM-resident:
    # W + K + K^T ~= 3*N*M*4 bytes).
    # TODO(synk): for N*M large enough that 3*N*M*4B exceeds VMEM, this stage
    # needs a manual-DMA streaming formulation over row/col blocks of K.
    out = pl.pallas_call(
        sinkhorn_kernel,
        out_shape=jax.ShapeDtypeStruct((1, 1), jnp.float32),
        in_specs=[pl.BlockSpec(memory_space=pltpu.MemorySpace.VMEM)],
        out_specs=pl.BlockSpec(memory_space=pltpu.MemorySpace.SMEM),
        compiler_params=pltpu.CompilerParams(vmem_limit_bytes=VMEM_LIMIT_BYTES),
    )(w)
    return out[0, 0]


def sinkhorn_loss_ref(y_s, y_t):
    """Pure-JAX reference mirroring the PyTorch forward exactly."""
    p_s = jax.nn.softmax(y_s / T, axis=1)
    p_t = jax.nn.softmax(y_t / T, axis=1)
    w = jnp.sum(jnp.abs(p_s[:, None, :] - p_t[None, :, :]), axis=-1)
    x = jnp.exp(-w / EPSILON)
    for _ in range(N_SINKHORN_ITERS):
        x = x / jnp.sum(x, axis=1, keepdims=True)
        x = x / jnp.sum(x, axis=0, keepdims=True)
    return LOSS_SCALE * jnp.sum(x * w)


if __name__ == "__main__":
    # Module has no learned parameters (T=2 is a constant); only inputs needed.
    key = jax.random.PRNGKey(0)
    k1, k2 = jax.random.split(key)
    N, C = 8, 32   # batch of 8 samples, 32 classes
    y_s = jax.random.normal(k1, (N, C), dtype=jnp.float32)
    y_t = jax.random.normal(k2, (N, C), dtype=jnp.float32)

    loss = sinkhorn_loss(y_s, y_t)
    jax.block_until_ready(loss)

    ref = sinkhorn_loss_ref(y_s, y_t)
    assert jnp.allclose(loss, ref, rtol=1e-4, atol=1e-6), (float(loss), float(ref))

    print("KERNEL_OK")
</pallas_src>

<mosaic_0001>
module attributes {stable_mosaic.version = 11 : i64} {
  func.func @cdist_kernel(%arg0: i32, %arg1: i32, %arg2: memref<8x32xf32, #tpu.memory_space<vmem>>, %arg3: memref<8x32xf32, #tpu.memory_space<vmem>>, %arg4: memref<8x8xf32, #tpu.memory_space<vmem>>) attributes {dimension_semantics = [#tpu.dimension_semantics<parallel>, #tpu.dimension_semantics<parallel>], iteration_bounds = array<i64: 1, 1>, scalar_prefetch = 0 : i64, scratch_operands = 0 : i64, tpu.core_type = #tpu.core_type<tc>, window_params = [{transform_indices = @transform_0, window_bounds = array<i64: 8, 32>}, {transform_indices = @transform_1, window_bounds = array<i64: 8, 32>}, {transform_indices = @transform_2, window_bounds = array<i64: 8, 8>}]} {
    %c0 = arith.constant 0 : index
    %c0_0 = arith.constant 0 : index
    %0 = vector.load %arg2[%c0, %c0_0] : memref<8x32xf32, #tpu.memory_space<vmem>>, vector<8x32xf32>
    %cst = arith.constant 5.000000e-01 : f32
    %1 = vector.broadcast %cst : f32 to vector<8x32xf32>
    %2 = arith.mulf %0, %1 : vector<8x32xf32>
    %cst_1 = arith.constant dense<0xFF800000> : vector<8xf32>
    %3 = vector.multi_reduction <maximumf>, %2, %cst_1 [1] : vector<8x32xf32> to vector<8xf32>
    %4 = vector.shape_cast %3 : vector<8xf32> to vector<8x1xf32>
    %5 = vector.broadcast %4 : vector<8x1xf32> to vector<8x32xf32>
    %6 = arith.subf %2, %5 : vector<8x32xf32>
    %7 = math.exp %6 : vector<8x32xf32>
    %cst_2 = arith.constant dense<0.000000e+00> : vector<8xf32>
    %8 = vector.multi_reduction <add>, %7, %cst_2 [1] : vector<8x32xf32> to vector<8xf32>
    %9 = vector.shape_cast %8 : vector<8xf32> to vector<8x1xf32>
    %cst_3 = arith.constant 1.000000e+00 : f32
    %10 = vector.broadcast %cst_3 : f32 to vector<8x1xf32>
    %11 = arith.divf %10, %9 : vector<8x1xf32>
    %12 = vector.broadcast %11 : vector<8x1xf32> to vector<8x32xf32>
    %13 = arith.mulf %7, %12 : vector<8x32xf32>
    %c0_4 = arith.constant 0 : index
    %c0_5 = arith.constant 0 : index
    %14 = vector.load %arg3[%c0_4, %c0_5] : memref<8x32xf32, #tpu.memory_space<vmem>>, vector<8x32xf32>
    %cst_6 = arith.constant 5.000000e-01 : f32
    %15 = vector.broadcast %cst_6 : f32 to vector<8x32xf32>
    %16 = arith.mulf %14, %15 : vector<8x32xf32>
    %cst_7 = arith.constant dense<0xFF800000> : vector<8xf32>
    %17 = vector.multi_reduction <maximumf>, %16, %cst_7 [1] : vector<8x32xf32> to vector<8xf32>
    %18 = vector.shape_cast %17 : vector<8xf32> to vector<8x1xf32>
    %19 = vector.broadcast %18 : vector<8x1xf32> to vector<8x32xf32>
    %20 = arith.subf %16, %19 : vector<8x32xf32>
    %21 = math.exp %20 : vector<8x32xf32>
    %cst_8 = arith.constant dense<0.000000e+00> : vector<8xf32>
    %22 = vector.multi_reduction <add>, %21, %cst_8 [1] : vector<8x32xf32> to vector<8xf32>
    %23 = vector.shape_cast %22 : vector<8xf32> to vector<8x1xf32>
    %cst_9 = arith.constant 1.000000e+00 : f32
    %24 = vector.broadcast %cst_9 : f32 to vector<8x1xf32>
    %25 = arith.divf %24, %23 : vector<8x1xf32>
    %26 = vector.broadcast %25 : vector<8x1xf32> to vector<8x32xf32>
    %27 = arith.mulf %21, %26 : vector<8x32xf32>
    %28 = tpu.transpose %27, [1, 0] : vector<8x32xf32> -> vector<32x8xf32>
    %cst_10 = arith.constant 0.000000e+00 : f32
    %29 = vector.broadcast %cst_10 : f32 to vector<8x8xf32>
    %30 = vector.extract_strided_slice %13 {offsets = [0, 0], sizes = [8, 8], strides = [1, 1]} : vector<8x32xf32> to vector<8x8xf32>
    %31 = vector.shape_cast %30 : vector<8x8xf32> to vector<8x8x1xf32>
    %32 = vector.extract_strided_slice %28 {offsets = [0, 0], sizes = [8, 8], strides = [1, 1]} : vector<32x8xf32> to vector<8x8xf32>
    %33 = vector.shape_cast %32 : vector<8x8xf32> to vector<1x8x8xf32>
    %34 = vector.broadcast %31 : vector<8x8x1xf32> to vector<8x8x8xf32>
    %35 = vector.broadcast %33 : vector<1x8x8xf32> to vector<8x8x8xf32>
    %36 = arith.subf %34, %35 : vector<8x8x8xf32>
    %37 = math.absf %36 : vector<8x8x8xf32>
    %cst_11 = arith.constant dense<0.000000e+00> : vector<8x8xf32>
    %38 = vector.multi_reduction <add>, %37, %cst_11 [1] : vector<8x8x8xf32> to vector<8x8xf32>
    %39 = arith.addf %29, %38 : vector<8x8xf32>
    %40 = vector.extract_strided_slice %13 {offsets = [0, 8], sizes = [8, 8], strides = [1, 1]} : vector<8x32xf32> to vector<8x8xf32>
    %41 = vector.shape_cast %40 : vector<8x8xf32> to vector<8x8x1xf32>
    %42 = vector.extract_strided_slice %28 {offsets = [8, 0], sizes = [8, 8], strides = [1, 1]} : vector<32x8xf32> to vector<8x8xf32>
    %43 = vector.shape_cast %42 : vector<8x8xf32> to vector<1x8x8xf32>
    %44 = vector.broadcast %41 : vector<8x8x1xf32> to vector<8x8x8xf32>
    %45 = vector.broadcast %43 : vector<1x8x8xf32> to vector<8x8x8xf32>
    %46 = arith.subf %44, %45 : vector<8x8x8xf32>
    %47 = math.absf %46 : vector<8x8x8xf32>
    %cst_12 = arith.constant dense<0.000000e+00> : vector<8x8xf32>
    %48 = vector.multi_reduction <add>, %47, %cst_12 [1] : vector<8x8x8xf32> to vector<8x8xf32>
    %49 = arith.addf %39, %48 : vector<8x8xf32>
    %50 = vector.extract_strided_slice %13 {offsets = [0, 16], sizes = [8, 8], strides = [1, 1]} : vector<8x32xf32> to vector<8x8xf32>
    %51 = vector.shape_cast %50 : vector<8x8xf32> to vector<8x8x1xf32>
    %52 = vector.extract_strided_slice %28 {offsets = [16, 0], sizes = [8, 8], strides = [1, 1]} : vector<32x8xf32> to vector<8x8xf32>
    %53 = vector.shape_cast %52 : vector<8x8xf32> to vector<1x8x8xf32>
    %54 = vector.broadcast %51 : vector<8x8x1xf32> to vector<8x8x8xf32>
    %55 = vector.broadcast %53 : vector<1x8x8xf32> to vector<8x8x8xf32>
    %56 = arith.subf %54, %55 : vector<8x8x8xf32>
    %57 = math.absf %56 : vector<8x8x8xf32>
    %cst_13 = arith.constant dense<0.000000e+00> : vector<8x8xf32>
    %58 = vector.multi_reduction <add>, %57, %cst_13 [1] : vector<8x8x8xf32> to vector<8x8xf32>
    %59 = arith.addf %49, %58 : vector<8x8xf32>
    %60 = vector.extract_strided_slice %13 {offsets = [0, 24], sizes = [8, 8], strides = [1, 1]} : vector<8x32xf32> to vector<8x8xf32>
    %61 = vector.shape_cast %60 : vector<8x8xf32> to vector<8x8x1xf32>
    %62 = vector.extract_strided_slice %28 {offsets = [24, 0], sizes = [8, 8], strides = [1, 1]} : vector<32x8xf32> to vector<8x8xf32>
    %63 = vector.shape_cast %62 : vector<8x8xf32> to vector<1x8x8xf32>
    %64 = vector.broadcast %61 : vector<8x8x1xf32> to vector<8x8x8xf32>
    %65 = vector.broadcast %63 : vector<1x8x8xf32> to vector<8x8x8xf32>
    %66 = arith.subf %64, %65 : vector<8x8x8xf32>
    %67 = math.absf %66 : vector<8x8x8xf32>
    %cst_14 = arith.constant dense<0.000000e+00> : vector<8x8xf32>
    %68 = vector.multi_reduction <add>, %67, %cst_14 [1] : vector<8x8x8xf32> to vector<8x8xf32>
    %69 = arith.addf %59, %68 : vector<8x8xf32>
    %c0_15 = arith.constant 0 : index
    %c0_16 = arith.constant 0 : index
    %70 = vector.load %arg4[%c0_15, %c0_16] : memref<8x8xf32, #tpu.memory_space<vmem>>, vector<8x8xf32>
    tpu.vector_store %arg4[%c0_15, %c0_16], %69 {strides = array<i32>} : memref<8x8xf32, #tpu.memory_space<vmem>>, vector<8x8xf32>,
    return
  }
  func.func @transform_0(%arg0: i32, %arg1: i32) -> (i32, i32) {
    %c0_i32 = arith.constant 0 : i32
    %c0_i32_0 = arith.constant 0 : i32
    return %arg0, %c0_i32 : i32, i32
  }
  func.func @transform_1(%arg0: i32, %arg1: i32) -> (i32, i32) {
    %c0_i32 = arith.constant 0 : i32
    %c0_i32_0 = arith.constant 0 : i32
    return %arg1, %c0_i32 : i32, i32
  }
  func.func @transform_2(%arg0: i32, %arg1: i32) -> (i32, i32) {
    %c0_i32 = arith.constant 0 : i32
    return %arg0, %arg1 : i32, i32
  }
}

</mosaic_0001>

<bundles_post_ra>
// kernel: tpu_custom_call.1
= control target key start
LH: loop header
LB: loop body
LE: loop exit
PB: predicated region body
PF: predicated region fallthrough
CT: control target
= control target key end

     0   :  { %7 = vsyncpa [#allocation3], 0  ;;  %s833_s0 = inlined_call_operand.hbm [shape: f32[8,32], index: 0, kind: input, shape index: {}]   ;;  %s834_s1 = inlined_call_operand.hbm [shape: f32[8,32], index: 1, kind: input, shape index: {}]   ;;  %s835_s2 = inlined_call_operand.hbm [shape: f32[8,8], index: 2, kind: output, shape index: {}]  }
   0x1   :  { %8 = vsyncpa [#allocation6], 0 }
   0x2   :  { %9 = vsyncpa [#allocation4], 0  ;;  %s688_s9 = smov [#allocation2]   ;;  %s689_s11 = smov [#allocation5]  }
   0x3   :  { %s16_s10 = sshll.u32 %s688_s9, 4  ;;  %s26_s12 = sshll.u32 %s689_s11, 4  ;;  %s17_s10 = int_to_ptr.vmem [resolvable:$true] %s16_s10  ;;  %s27_s12 = int_to_ptr.vmem [resolvable:$true] %s26_s12 }
   0x4   :  { %s630_s13 = scalar_lea.vmem %s17_s10, 128  ;;  %p635_p1 = scmp.lt.s32.totalorder %s17_s10, %s17_s10 }
   0x5   :  { %p631_p0 = scmp.ne.s32.totalorder %s17_s10, %s630_s13  ;;  %p636_p2 = scmp.lt.s32.totalorder %s630_s13, %s630_s13 }
   0x7   :  { %p637_p3 = por %p636_p2, %p635_p1 }
   0x9   :  { %p638_p4 = pnand %p637_p3, %p631_p0 }
   0xb   :  { %641 = shalt.err (!%p638_p4)
}
   0xc   :  { %19 = dma.hbm_to_vmem [thread:$0]  %s833_s0, 128, %s17_s10, [#allocation3]  }
   0xd   :  { %s650_s16 = scalar_lea.vmem %s27_s12, 128  ;;  %p655_p6 = scmp.lt.s32.totalorder %s27_s12, %s27_s12 }
   0xe   :  { %p651_p5 = scmp.ne.s32.totalorder %s27_s12, %s650_s16  ;;  %p656_p7 = scmp.lt.s32.totalorder %s650_s16, %s650_s16 }
  0x10   :  { %p657_p8 = por %p656_p7, %p655_p6 }
  0x12   :  { %p658_p9 = pnand %p657_p8, %p651_p5 }
  0x14   :  { %661 = shalt.err (!%p658_p9)
}
  0x15   :  { %29 = dma.hbm_to_vmem [thread:$0]  %s834_s1, 128, %s27_s12, [#allocation6]  }
  0x16   :  { %682 = dma.done.wait [#allocation3], 128  }
  0x17   :  { %683 = vsyncadd [#allocation3], 4294967168 }
  0x18   :  { %684 = dma.done.wait [#allocation6], 128  }
  0x19   :  { %685 = vsyncadd [#allocation6], 4294967168  ;;  %v36_v0 = vld [vmem:[#allocation2] sm:$0xff]  ;;  %vm38_vm0 = vcmask 261120   ;;  %v51_v1 = vld [vmem:[#allocation5] sm:$0xff]  ;;  %v97_v18 = vlaneseq  ;;  %vm169_vm1 = vcmask 64512  }
  0x1a   :  { %v37_v2 = vmul.f32 0.5, %v36_v0  ;;  %v52_v3 = vmul.f32 0.5, %v51_v1  ;;  %vm578_vm2 = vcmask 1041409   ;;  %vm580_vm3 = vcmask 1042434   ;;  %s690_s0 = smov [#allocation7]  }
  0x1b   :  { %v98_v19 = vshrl.u32 %v97_v18, 7  ;;  %vm582_vm4 = vcmask 1043459   ;;  %vm584_vm5 = vcmask 1044484   ;;  %vm586_vm6 = vcmask 1045509   ;;  %s600_s1 = sshll.u32 %s690_s0, 4  ;;  %s601_s1 = int_to_ptr.vmem [resolvable:$true] %s600_s1 }
  0x1c   :  { %v39_v4 = vsel %vm38_vm0, %v37_v2, -inf  ;;  %v53_v5 = vsel %vm38_vm0, %v52_v3, -inf  ;;  %vm588_vm7 = vcmask 1046534   ;;  %vm590_vm8 = vcmask 1047559   ;;  %s662_s19 = scalar_lea.vmem %s601_s1, 128  ;;  %p667_p11 = scmp.lt.s32.totalorder %s601_s1, %s601_s1 }
  0x1d   :  { %40 = vmax.xlane.f32.xlu0 %v39_v4  ;;  %v99_v20 = vsub.s32 0, %v98_v19  ;;  %v141_v22 = vsub.s32 6, %v98_v19  ;;  %v106_v25 = vsub.s32 1, %v98_v19  ;;  %v113_v30 = vsub.s32 2, %v98_v19  ;;  %p663_p10 = scmp.ne.s32.totalorder %s601_s1, %s662_s19  ;;  %p668_p12 = scmp.lt.s32.totalorder %s662_s19, %s662_s19 }
  0x1e   :  { %v120_v32 = vsub.s32 3, %v98_v19  ;;  %v127_v34 = vsub.s32 4, %v98_v19  ;;  %v134_v36 = vsub.s32 5, %v98_v19  ;;  %v148_v38 = vsub.s32 7, %v98_v19 }
  0x1f   :  { %p669_p13 = por %p668_p12, %p667_p11 }
  0x21   :  { %54 = vmax.xlane.f32.xlu0 %v53_v5  ;;  %p670_p0 = pnand %p669_p13, %p663_p10 }
  0xa6   :  { %v41_v6 = vpop.xlane.xlu0 %40 }
  0xa7   :  { %v42_v7 = vsub.f32 %v37_v2, %v41_v6 }
  0xa9   :  { %v43_v8 = vmul.f32 1.442695, %v42_v7 }
  0xaa   :  { %v55_v9 = vpop.xlane.xlu0 %54 }
  0xab   :  { %614 = vpow2.f32 %v43_v8  ;;  %v56_v10 = vsub.f32 %v52_v3, %v55_v9 }
  0xad   :  { %v57_v11 = vmul.f32 1.442695, %v56_v10 }
  0xaf   :  { %616 = vpow2.f32 %v57_v11 }
  0xb8   :  { %v615_v12 = vpop.eup %614 }
  0xb9   :  { %v45_v13 = vsel %vm38_vm0, %v615_v12, 0.0 }
  0xba   :  { %46 = vadd.xlane.f32.xlu1 %v45_v13 }
  0xbc   :  { %v617_v14 = vpop.eup %616 }
  0xbd   :  { %v59_v15 = vsel %vm38_vm0, %v617_v14, 0.0 }
  0xbe   :  { %60 = vadd.xlane.f32.xlu1 %v59_v15 }
 0x143   :  { %v47_v16 = vpop.xlane.xlu1 %46 }
 0x144   :  { %618 = vrcp.f32 %v47_v16 }
 0x147   :  { %v61_v17 = vpop.xlane.xlu1 %60 }
 0x148   :  { %620 = vrcp.f32 %v61_v17 }
 0x151   :  { %v619_v21 = vpop.eup %618 }
 0x152   :  { %v50_v23 = vmul.f32 %v619_v21, %v615_v12 }
 0x154   :  { %v100_v24 = vrot.slane %v50_v23, %v99_v20  ;;  %v142_v27 = vrot.slane %v50_v23, %v141_v22  ;;  %v107_v29 = vrot.slane %v50_v23, %v106_v25  ;;  %v114_v31 = vrot.slane %v50_v23, %v113_v30 }
 0x155   :  { %v621_v26 = vpop.eup %620  ;;  %v121_v33 = vrot.slane %v50_v23, %v120_v32  ;;  %v128_v35 = vrot.slane %v50_v23, %v127_v34  ;;  %v135_v37 = vrot.slane %v50_v23, %v134_v36  ;;  %v149_v39 = vrot.slane %v50_v23, %v148_v38 }
 0x156   :  { %102 = vbcast.lane.b32.xlu1 %v100_v24, 256  ;;  %v64_v28 = vmul.f32 %v621_v26, %v617_v14 }
 0x158   :  { %65 = vxpose.xlu0.b32.start.end [1/1] (short) (narrow) %v64_v28, 32 }
 0x15a   :  { %109 = vbcast.lane.b32.xlu1 %v107_v29, 256 }
 0x15e   :  { %236 = vbcast.lane.b32.xlu1 %v100_v24, 264 }
 0x162   :  { %240 = vbcast.lane.b32.xlu1 %v107_v29, 264 }
 0x166   :  { %116 = vbcast.lane.b32.xlu1 %v114_v31, 256 }
 0x16a   :  { %244 = vbcast.lane.b32.xlu1 %v114_v31, 264 }
 0x16e   :  { %123 = vbcast.lane.b32.xlu1 %v121_v33, 256 }
 0x172   :  { %248 = vbcast.lane.b32.xlu1 %v121_v33, 264 }
 0x176   :  { %352 = vbcast.lane.b32.xlu1 %v107_v29, 272 }
 0x17a   :  { %130 = vbcast.lane.b32.xlu1 %v128_v35, 256 }
 0x17e   :  { %252 = vbcast.lane.b32.xlu1 %v128_v35, 264 }
 0x182   :  { %356 = vbcast.lane.b32.xlu1 %v114_v31, 272 }
 0x186   :  { %137 = vbcast.lane.b32.xlu1 %v135_v37, 256 }
 0x18a   :  { %256 = vbcast.lane.b32.xlu1 %v135_v37, 264 }
 0x18d   :  { %348 = vbcast.lane.b32.xlu0 %v100_v24, 272 }
 0x18e   :  { %360 = vbcast.lane.b32.xlu1 %v121_v33, 272 }
 0x191   :  { %264 = vbcast.lane.b32.xlu0 %v149_v39, 264 }
 0x192   :  { %460 = vbcast.lane.b32.xlu1 %v100_v24, 280 }
 0x195   :  { %472 = vbcast.lane.b32.xlu0 %v121_v33, 280 }
 0x196   :  { %464 = vbcast.lane.b32.xlu1 %v107_v29, 280 }
 0x199   :  { %476 = vbcast.lane.b32.xlu0 %v128_v35, 280 }
 0x19a   :  { %144 = vbcast.lane.b32.xlu1 %v142_v27, 256 }
 0x19d   :  { %480 = vbcast.lane.b32.xlu0 %v135_v37, 280 }
 0x19e   :  { %260 = vbcast.lane.b32.xlu1 %v142_v27, 264 }
 0x1a1   :  { %488 = vbcast.lane.b32.xlu0 %v149_v39, 280 }
 0x1a2   :  { %364 = vbcast.lane.b32.xlu1 %v128_v35, 272 }
 0x1a6   :  { %468 = vbcast.lane.b32.xlu1 %v114_v31, 280 }
 0x1aa   :  { %151 = vbcast.lane.b32.xlu1 %v149_v39, 256 }
 0x1ae   :  { %368 = vbcast.lane.b32.xlu1 %v135_v37, 272 }
 0x1b2   :  { %372 = vbcast.lane.b32.xlu1 %v142_v27, 272 }
 0x1b6   :  { %376 = vbcast.lane.b32.xlu1 %v149_v39, 272 }
 0x1ba   :  { %484 = vbcast.lane.b32.xlu1 %v142_v27, 280 }
 0x1c8   :  { %v103_v40 = vpop.permute.xlu1 %102 }
 0x1cc   :  { %v110_v41 = vpop.permute.xlu1 %109 }
 0x1d0   :  { %v237_v42 = vpop.permute.xlu1 %236 }
 0x1d4   :  { %v716_v43 = vpop.trf.xlu0  ;;  %v241_v44 = vpop.permute.xlu1 %240 }
 0x1d5   :  { %v153_v45 = vsub.f32 %v103_v40, %v716_v43  ;;  %v154_v46 = vsub.f32 %v110_v41, %v716_v43 }
 0x1d7   :  { %v161_v47 = vand.u32 2147483647, %v153_v45  ;;  %v162_v48 = vand.u32 2147483647, %v154_v46 }
 0x1d8   :  { %v720_v49 = vpop.trf.xlu0  ;;  %v117_v50 = vpop.permute.xlu1 %116 }
 0x1d9   :  { %v266_v51 = vsub.f32 %v237_v42, %v720_v49  ;;  %v267_v52 = vsub.f32 %v241_v44, %v720_v49  ;;  %v155_v53 = vsub.f32 %v117_v50, %v716_v43  ;;  %v177_v54 = vsel %vm169_vm1, %v162_v48, 0.0 }
 0x1da   :  { %v178_v55 = vrot.slane %v177_v54, 4  ;;  %v170_v56 = vsel %vm169_vm1, %v161_v47, 0.0 }
 0x1db   :  { %v274_v57 = vand.u32 2147483647, %v266_v51  ;;  %v275_v58 = vand.u32 2147483647, %v267_v52  ;;  %v163_v59 = vand.u32 2147483647, %v155_v53 }
 0x1dc   :  { %v245_v60 = vpop.permute.xlu1 %244  ;;  %v179_v61 = vadd.f32 %v178_v55, %v177_v54  ;;  %v171_v62 = vrot.slane %v170_v56, 4 }
 0x1dd   :  { %v184_v63 = vsel %vm169_vm1, %v163_v59, 0.0  ;;  %v268_v0 = vsub.f32 %v245_v60, %v720_v49  ;;  %v289_v1 = vsel %vm169_vm1, %v275_v58, 0.0  ;;  %v282_v2 = vsel %vm169_vm1, %v274_v57, 0.0  ;;  %v740_v58 = vpop.trf.xlu0 }
 0x1de   :  { %v185_v3 = vrot.slane %v184_v63, 4  ;;  %v180_v4 = vrot.slane %v179_v61, 2  ;;  %v290_v5 = vrot.slane %v289_v1, 4  ;;  %v172_v6 = vadd.f32 %v171_v62, %v170_v56 }
 0x1df   :  { %v276_v7 = vand.u32 2147483647, %v268_v0  ;;  %v283_v8 = vrot.slane %v282_v2, 4 }
 0x1e0   :  { %v186_v9 = vadd.f32 %v185_v3, %v184_v63  ;;  %v124_v10 = vpop.permute.xlu1 %123  ;;  %v181_v11 = vadd.f32 %v180_v4, %v179_v61  ;;  %v291_v12 = vadd.f32 %v290_v5, %v289_v1  ;;  %v173_v13 = vrot.slane %v172_v6, 2 }
 0x1e1   :  { %v296_v14 = vsel %vm169_vm1, %v276_v7, 0.0  ;;  %v156_v15 = vsub.f32 %v124_v10, %v716_v43  ;;  %v284_v16 = vadd.f32 %v283_v8, %v282_v2 }
 0x1e2   :  { %v187_v17 = vrot.slane %v186_v9, 2  ;;  %v297_v18 = vrot.slane %v296_v14, 4  ;;  %v292_v19 = vrot.slane %v291_v12, 2  ;;  %v182_v21 = vrot.slane %v181_v11, 1 }
 0x1e3   :  { %v164_v20 = vand.u32 2147483647, %v156_v15  ;;  %v174_v22 = vadd.f32 %v173_v13, %v172_v6  ;;  %v285_v23 = vrot.slane %v284_v16, 2  ;;  %v751_v13 = vpop.trf.xlu0 }
 0x1e4   :  { %v188_v24 = vadd.f32 %v187_v17, %v186_v9  ;;  %v298_v25 = vadd.f32 %v297_v18, %v296_v14  ;;  %v249_v26 = vpop.permute.xlu1 %248  ;;  %v293_v27 = vadd.f32 %v292_v19, %v291_v12  ;;  %v183_v36 = vadd.f32 %v182_v21, %v181_v11 }
 0x1e5   :  { %v191_v28 = vsel %vm169_vm1, %v164_v20, 0.0  ;;  %v269_v29 = vsub.f32 %v249_v26, %v720_v49  ;;  %v175_v30 = vrot.slane %v174_v22, 1  ;;  %v286_v31 = vadd.f32 %v285_v23, %v284_v16 }
 0x1e6   :  { %v299_v32 = vrot.slane %v298_v25, 2  ;;  %v192_v33 = vrot.slane %v191_v28, 4  ;;  %v294_v34 = vrot.slane %v293_v27, 1  ;;  %v189_v38 = vrot.slane %v188_v24, 1 }
 0x1e7   :  { %v277_v35 = vand.u32 2147483647, %v269_v29  ;;  %v287_v37 = vrot.slane %v286_v31, 1  ;;  %v176_v45 = vadd.f32 %v175_v30, %v174_v22 }
 0x1e8   :  { %v300_v39 = vadd.f32 %v299_v32, %v298_v25  ;;  %v193_v40 = vadd.f32 %v192_v33, %v191_v28  ;;  %v295_v41 = vadd.f32 %v294_v34, %v293_v27  ;;  %v353_v42 = vpop.permute.xlu1 %352  ;;  %v190_v53 = vadd.f32 %v189_v38, %v188_v24 }
 0x1e9   :  { %v303_v44 = vsel %vm169_vm1, %v277_v35, 0.0  ;;  %v288_v46 = vadd.f32 %v287_v37, %v286_v31  ;;  %v379_v63 = vsub.f32 %v353_v42, %v740_v58 }
 0x1ea   :  { %v301_v47 = vrot.slane %v300_v39, 1  ;;  %v194_v48 = vrot.slane %v193_v40, 2  ;;  %v304_v50 = vrot.slane %v303_v44, 4  ;;  %v736_v51 = vadd.f32 %v295_v41, %v183_v36 }
 0x1eb   :  { %v738_v52 = vadd.f32 %v288_v46, %v176_v45  ;;  %v387_v4 = vand.u32 2147483647, %v379_v63 }
 0x1ec   :  { %v302_v54 = vadd.f32 %v301_v47, %v300_v39  ;;  %v195_v55 = vadd.f32 %v194_v48, %v193_v40  ;;  %v305_v56 = vadd.f32 %v304_v50, %v303_v44  ;;  %v131_v57 = vpop.permute.xlu1 %130 }
 0x1ed   :  { %v157_v6 = vsub.f32 %v131_v57, %v716_v43  ;;  %v401_v8 = vsel %vm169_vm1, %v387_v4, 0.0 }
 0x1ee   :  { %v742_v59 = vadd.f32 %v302_v54, %v190_v53  ;;  %v306_v60 = vrot.slane %v305_v56, 2  ;;  %v196_v61 = vrot.slane %v195_v55, 1  ;;  %v402_v14 = vrot.slane %v401_v8, 4 }
 0x1ef   :  { %v165_v11 = vand.u32 2147483647, %v157_v6 }
 0x1f0   :  { %v307_v62 = vadd.f32 %v306_v60, %v305_v56  ;;  %v253_v0 = vpop.permute.xlu1 %252  ;;  %v197_v2 = vadd.f32 %v196_v61, %v195_v55  ;;  %v403_v20 = vadd.f32 %v402_v14, %v401_v8 }
 0x1f1   :  { %v270_v9 = vsub.f32 %v253_v0, %v720_v49  ;;  %v198_v17 = vsel %vm169_vm1, %v165_v11, 0.0 }
 0x1f2   :  { %v308_v1 = vrot.slane %v307_v62, 1  ;;  %v199_v22 = vrot.slane %v198_v17, 4  ;;  %v404_v30 = vrot.slane %v403_v20, 2 }
 0x1f3   :  { %v278_v15 = vand.u32 2147483647, %v270_v9 }
 0x1f4   :  { %v309_v3 = vadd.f32 %v308_v1, %v307_v62  ;;  %v357_v5 = vpop.permute.xlu1 %356  ;;  %v200_v35 = vadd.f32 %v199_v22, %v198_v17  ;;  %v405_v44 = vadd.f32 %v404_v30, %v403_v20 }
 0x1f5   :  { %v380_v12 = vsub.f32 %v357_v5, %v740_v58  ;;  %v310_v23 = vsel %vm169_vm1, %v278_v15, 0.0 }
 0x1f6   :  { %v746_v7 = vadd.f32 %v309_v3, %v197_v2  ;;  %v311_v31 = vrot.slane %v310_v23, 4  ;;  %v201_v50 = vrot.slane %v200_v35, 2  ;;  %v406_v2 = vrot.slane %v405_v44, 1 }
 0x1f7   :  { %v388_v18 = vand.u32 2147483647, %v380_v12 }
 0x1f8   :  { %v138_v10 = vpop.permute.xlu1 %137  ;;  %v312_v45 = vadd.f32 %v311_v31, %v310_v23  ;;  %v202_v6 = vadd.f32 %v201_v50, %v200_v35  ;;  %v407_v20 = vadd.f32 %v406_v2, %v405_v44 }
 0x1f9   :  { %v408_v26 = vsel %vm169_vm1, %v388_v18, 0.0  ;;  %v158_v27 = vsub.f32 %v138_v10, %v716_v43 }
 0x1fa   :  { %v409_v36 = vrot.slane %v408_v26, 4  ;;  %v313_v3 = vrot.slane %v312_v45, 2 }
 0x1fb   :  { %v166_v38 = vand.u32 2147483647, %v158_v27 }
 0x1fc   :  { %v257_v16 = vpop.permute.xlu1 %256  ;;  %v410_v53 = vadd.f32 %v409_v36, %v408_v26 }
 0x1fd   :  { %v271_v19 = vsub.f32 %v257_v16, %v720_v49  ;;  %v205_v56 = vsel %vm169_vm1, %v166_v38, 0.0 }
 0x1fe   :  { %v411_v8 = vrot.slane %v410_v53, 2  ;;  %v206_v9 = vrot.slane %v205_v56, 4 }
 0x1ff   :  { %v349_v21 = vpop.permute.xlu0 %348  ;;  %v279_v29 = vand.u32 2147483647, %v271_v19 }
 0x200   :  { %v378_v24 = vsub.f32 %v349_v21, %v740_v58  ;;  %v361_v25 = vpop.permute.xlu1 %360  ;;  %v314_v21 = vadd.f32 %v313_v3, %v312_v45  ;;  %v207_v26 = vadd.f32 %v206_v9, %v205_v56 }
 0x201   :  { %v381_v28 = vsub.f32 %v361_v25, %v740_v58  ;;  %v317_v41 = vsel %vm169_vm1, %v279_v29, 0.0  ;;  %v412_v25 = vadd.f32 %v411_v8, %v410_v53 }
 0x202   :  { %v386_v32 = vand.u32 2147483647, %v378_v24  ;;  %v318_v57 = vrot.slane %v317_v41, 4  ;;  %v203_v24 = vrot.slane %v202_v6, 1  ;;  %v315_v35 = vrot.slane %v314_v21, 1 }
 0x203   :  { %v389_v33 = vand.u32 2147483647, %v381_v28  ;;  %v265_v34 = vpop.permute.xlu0 %264 }
 0x204   :  { %v461_v37 = vpop.permute.xlu1 %460  ;;  %v394_v39 = vsel %vm169_vm1, %v386_v32, 0.0  ;;  %v273_v4 = vsub.f32 %v265_v34, %v720_v49  ;;  %v319_v15 = vadd.f32 %v318_v57, %v317_v41  ;;  %v413_v41 = vrot.slane %v412_v25, 1 }
 0x205   :  { %v490_v40 = vsub.f32 %v461_v37, %v751_v13  ;;  %v395_v42 = vrot.slane %v394_v39, 4  ;;  %v415_v46 = vsel %vm169_vm1, %v389_v33, 0.0  ;;  %v316_v57 = vadd.f32 %v315_v35, %v314_v21 }
 0x206   :  { %v416_v63 = vrot.slane %v415_v46, 4  ;;  %v281_v22 = vand.u32 2147483647, %v273_v4  ;;  %v320_v32 = vrot.slane %v319_v15, 2 }
 0x207   :  { %v498_v47 = vand.u32 2147483647, %v490_v40  ;;  %v473_v48 = vpop.permute.xlu0 %472  ;;  %v396_v54 = vadd.f32 %v395_v42, %v394_v39  ;;  %v451_v39 = vadd.f32 %v407_v20, %v736_v51  ;;  %v204_v40 = vadd.f32 %v203_v24, %v202_v6 }
 0x208   :  { %v465_v55 = vpop.permute.xlu1 %464  ;;  %v493_v1 = vsub.f32 %v473_v48, %v751_v13  ;;  %v417_v16 = vadd.f32 %v416_v63, %v415_v46  ;;  %v331_v36 = vsel %vm169_vm1, %v281_v22, 0.0  ;;  %v208_v42 = vrot.slane %v207_v26, 2 }
 0x209   :  { %v506_v60 = vsel %vm169_vm1, %v498_v47, 0.0  ;;  %v491_v61 = vsub.f32 %v465_v55, %v751_v13  ;;  %v397_v62 = vrot.slane %v396_v54, 2  ;;  %v321_v53 = vadd.f32 %v320_v32, %v319_v15 }
 0x20a   :  { %v507_v0 = vrot.slane %v506_v60, 4  ;;  %v501_v18 = vand.u32 2147483647, %v493_v1  ;;  %v418_v33 = vrot.slane %v417_v16, 2  ;;  %v332_v55 = vrot.slane %v331_v36, 4 }
 0x20b   :  { %v499_v5 = vand.u32 2147483647, %v491_v61  ;;  %v398_v12 = vadd.f32 %v397_v62, %v396_v54  ;;  %v477_v19 = vpop.permute.xlu0 %476  ;;  %v414_v51 = vadd.f32 %v413_v41, %v412_v25  ;;  %v776_v63 = vadd.f32 %v208_v42, %v207_v26 }
 0x20c   :  { %v508_v10 = vadd.f32 %v507_v0, %v506_v60  ;;  %v145_v11 = vpop.permute.xlu1 %144  ;;  %v494_v31 = vsub.f32 %v477_v19, %v751_v13  ;;  %v527_v34 = vsel %vm169_vm1, %v501_v18, 0.0  ;;  %v419_v54 = vadd.f32 %v418_v33, %v417_v16 }
 0x20d   :  { %v513_v14 = vsel %vm169_vm1, %v499_v5, 0.0  ;;  %v399_v29 = vrot.slane %v398_v12, 1  ;;  %v528_v47 = vrot.slane %v527_v34, 4  ;;  %v159_v56 = vsub.f32 %v145_v11, %v716_v43 }
 0x20e   :  { %v509_v17 = vrot.slane %v508_v10, 2  ;;  %v514_v23 = vrot.slane %v513_v14, 4  ;;  %v502_v50 = vand.u32 2147483647, %v494_v31  ;;  %v322_v8 = vrot.slane %v321_v53, 1 }
 0x20f   :  { %v481_v44 = vpop.permute.xlu0 %480  ;;  %v400_v46 = vadd.f32 %v399_v29, %v398_v12  ;;  %v529_v4 = vadd.f32 %v528_v47, %v527_v34  ;;  %v420_v9 = vrot.slane %v419_v54, 1  ;;  %v167_v11 = vand.u32 2147483647, %v159_v56 }
 0x210   :  { %v510_v27 = vadd.f32 %v509_v17, %v508_v10  ;;  %v261_v28 = vpop.permute.xlu1 %260  ;;  %v515_v30 = vadd.f32 %v514_v23, %v513_v14  ;;  %v495_v0 = vsub.f32 %v481_v44, %v751_v13  ;;  %v534_v6 = vsel %vm169_vm1, %v502_v50, 0.0 }
 0x211   :  { %v272_v62 = vsub.f32 %v261_v28, %v720_v49  ;;  %v450_v3 = vadd.f32 %v400_v46, %v738_v52  ;;  %v333_v10 = vadd.f32 %v332_v55, %v331_v36  ;;  %v782_v17 = vadd.f32 %v316_v57, %v204_v40 }
 0x212   :  { %v511_v37 = vrot.slane %v510_v27, 1  ;;  %v516_v38 = vrot.slane %v515_v30, 2  ;;  %v785_v18 = vadd.f32 %v414_v51, %v742_v59  ;;  %v535_v19 = vrot.slane %v534_v6, 4 }
 0x213   :  { %v489_v12 = vpop.permute.xlu0 %488  ;;  %v280_v15 = vand.u32 2147483647, %v272_v62  ;;  %v503_v52 = vand.u32 2147483647, %v495_v0  ;;  %v530_v21 = vrot.slane %v529_v4, 2  ;;  %v210_v25 = vrot.slane %v776_v63, 1 }
 0x214   :  { %v365_v45 = vpop.permute.xlu1 %364  ;;  %v517_v48 = vadd.f32 %v516_v38, %v515_v30  ;;  %v512_v60 = vadd.f32 %v511_v37, %v510_v27  ;;  %v497_v23 = vsub.f32 %v489_v12, %v751_v13  ;;  %v793_v26 = vadd.f32 %v322_v8, %v321_v53 }
 0x215   :  { %v382_v1 = vsub.f32 %v365_v45, %v740_v58  ;;  %v334_v27 = vrot.slane %v333_v10, 2  ;;  %v421_v59 = vadd.f32 %v420_v9, %v419_v54  ;;  %v212_v29 = vsel %vm169_vm1, %v167_v11, 0.0 }
 0x216   :  { %v518_v61 = vrot.slane %v517_v48, 1  ;;  %v562_v49 = vadd.f32 %v512_v60, %v450_v3  ;;  %v324_v30 = vsel %vm169_vm1, %v280_v15, 0.0  ;;  %v536_v32 = vadd.f32 %v535_v19, %v534_v6 }
 0x217   :  { %v390_v16 = vand.u32 2147483647, %v382_v1  ;;  %v541_v33 = vsel %vm169_vm1, %v503_v52, 0.0  ;;  %v531_v37 = vadd.f32 %v530_v21, %v529_v4  ;;  %v505_v38 = vand.u32 2147483647, %v497_v23 }
 0x218   :  { %v469_v2 = vpop.permute.xlu1 %468  ;;  %v519_v5 = vadd.f32 %v518_v61, %v517_v48  ;;  %v801_v41 = vadd.f32 %v334_v27, %v333_v10  ;;  %v213_v42 = vrot.slane %v212_v29, 4  ;;  %v325_v44 = vrot.slane %v324_v30, 4 }
 0x219   :  { %v422_v24 = vsel %vm169_vm1, %v390_v16, 0.0  ;;  %v492_v28 = vsub.f32 %v469_v2, %v751_v13  ;;  %v453_v46 = vadd.f32 %v421_v59, %v746_v7  ;;  %v537_v50 = vrot.slane %v536_v32, 2 }
 0x21a   :  { %v563_v14 = vadd.f32 %v519_v5, %v451_v39  ;;  %v423_v34 = vrot.slane %v422_v24, 4  ;;  %v532_v57 = vrot.slane %v531_v37, 1  ;;  %v555_v60 = vsel %vm169_vm1, %v505_v38, 0.0 }
 0x21b   :  { %v500_v35 = vand.u32 2147483647, %v492_v28  ;;  %v214_v51 = vadd.f32 %v213_v42, %v212_v29  ;;  %v326_v0 = vadd.f32 %v325_v44, %v324_v30  ;;  %v809_v6 = vadd.f32 %v537_v50, %v536_v32 }
 0x21c   :  { %v152_v20 = vpop.permute.xlu1 %151  ;;  %v788_v22 = vsel %vm578_vm2, %v563_v14, %v562_v49  ;;  %v424_v53 = vadd.f32 %v423_v34, %v422_v24  ;;  %v556_v8 = vrot.slane %v555_v60, 4  ;;  %v533_v16 = vadd.f32 %v532_v57, %v531_v37 }
 0x21d   :  { %v160_v31 = vsub.f32 %v152_v20, %v716_v43  ;;  %v520_v45 = vsel %vm169_vm1, %v500_v35, 0.0  ;;  %v542_v43 = vrot.slane %v541_v33, 4  ;;  %v215_v19 = vrot.slane %v214_v51, 2 }
 0x21e   :  { %v521_v47 = vrot.slane %v520_v45, 4  ;;  %v425_v9 = vrot.slane %v424_v53, 2  ;;  %v327_v52 = vrot.slane %v326_v0, 2  ;;  %v557_v28 = vadd.f32 %v556_v8, %v555_v60 }
 0x21f   :  { %v168_v39 = vand.u32 2147483647, %v160_v31  ;;  %v543_v2 = vadd.f32 %v542_v43, %v541_v33  ;;  %v336_v60 = vrot.slane %v801_v41, 1 }
 0x220   :  { %v369_v36 = vpop.permute.xlu1 %368  ;;  %v522_v61 = vadd.f32 %v521_v47, %v520_v45  ;;  %v426_v59 = vadd.f32 %v425_v9, %v424_v53  ;;  %v558_v50 = vrot.slane %v557_v28, 2 }
 0x221   :  { %v383_v40 = vsub.f32 %v369_v36, %v740_v58  ;;  %v219_v48 = vsel %vm169_vm1, %v168_v39, 0.0  ;;  %v544_v21 = vrot.slane %v543_v2, 2  ;;  %v328_v36 = vadd.f32 %v327_v52, %v326_v0 }
 0x222   :  { %v220_v54 = vrot.slane %v219_v48, 4  ;;  %v523_v3 = vrot.slane %v522_v61, 2  ;;  %v216_v39 = vadd.f32 %v215_v19, %v214_v51  ;;  %v427_v43 = vrot.slane %v426_v59, 1 }
 0x223   :  { %v391_v55 = vand.u32 2147483647, %v383_v40  ;;  %v545_v45 = vadd.f32 %v544_v21, %v543_v2 }
 0x224   :  { %v373_v56 = vpop.permute.xlu1 %372  ;;  %v221_v1 = vadd.f32 %v220_v54, %v219_v48  ;;  %v524_v12 = vadd.f32 %v523_v3, %v522_v61  ;;  %v217_v61 = vrot.slane %v216_v39, 1  ;;  %v428_v51 = vadd.f32 %v427_v43, %v426_v59 }
 0x225   :  { %v384_v62 = vsub.f32 %v373_v56, %v740_v58  ;;  %v429_v7 = vsel %vm169_vm1, %v391_v55, 0.0  ;;  %v546_v2 = vrot.slane %v545_v45, 1  ;;  %v559_v3 = vadd.f32 %v558_v50, %v557_v28 }
 0x226   :  { %v430_v4 = vrot.slane %v429_v7, 4  ;;  %v222_v10 = vrot.slane %v221_v1, 2  ;;  %v525_v23 = vrot.slane %v524_v12, 1 }
 0x227   :  { %v392_v5 = vand.u32 2147483647, %v384_v62  ;;  %v560_v19 = vrot.slane %v559_v3, 1 }
 0x228   :  { %v377_v11 = vpop.permute.xlu1 %376  ;;  %v431_v49 = vadd.f32 %v430_v4, %v429_v7  ;;  %v223_v29 = vadd.f32 %v222_v10, %v221_v1  ;;  %v526_v32 = vadd.f32 %v525_v23, %v524_v12  ;;  %v454_v12 = vadd.f32 %v428_v51, %v782_v17 }
 0x229   :  { %v436_v14 = vsel %vm169_vm1, %v392_v5, 0.0  ;;  %v385_v15 = vsub.f32 %v377_v11, %v740_v58  ;;  %v565_v58 = vadd.f32 %v533_v16, %v453_v46  ;;  %v329_v46 = vrot.slane %v328_v36, 1 }
 0x22a   :  { %v437_v20 = vrot.slane %v436_v14, 4  ;;  %v432_v24 = vrot.slane %v431_v49, 2  ;;  %v564_v40 = vadd.f32 %v526_v32, %v785_v18  ;;  %v224_v54 = vrot.slane %v223_v29, 1 }
 0x22b   :  { %v393_v27 = vand.u32 2147483647, %v385_v15  ;;  %v211_v18 = vadd.f32 %v210_v25, %v776_v63  ;;  %v539_v5 = vrot.slane %v809_v6, 1  ;;  %v330_v8 = vadd.f32 %v329_v46, %v328_v36 }
 0x22c   :  { %v438_v30 = vadd.f32 %v437_v20, %v436_v14  ;;  %v485_v31 = vpop.permute.xlu1 %484  ;;  %v433_v33 = vadd.f32 %v432_v24, %v431_v49  ;;  %v581_v53 = vsel %vm580_vm3, %v564_v40, %v788_v22  ;;  %v225_v4 = vadd.f32 %v224_v54, %v223_v29 }
 0x22d   :  { %v443_v34 = vsel %vm169_vm1, %v393_v27, 0.0  ;;  %v496_v35 = vsub.f32 %v485_v31, %v751_v13  ;;  %v583_v57 = vsel %vm582_vm4, %v565_v58, %v581_v53  ;;  %v343_v7 = vadd.f32 %v793_v26, %v211_v18 }
 0x22e   :  { %v439_v37 = vrot.slane %v438_v30, 2  ;;  %v444_v38 = vrot.slane %v443_v34, 4  ;;  %v434_v42 = vrot.slane %v433_v33, 1  ;;  %v337_v63 = vadd.f32 %v336_v60, %v801_v41 }
 0x22f   :  { %v504_v44 = vand.u32 2147483647, %v496_v35  ;;  %v218_v25 = vadd.f32 %v217_v61, %v216_v39  ;;  %v547_v16 = vadd.f32 %v546_v2, %v545_v45  ;;  %v540_v52 = vadd.f32 %v539_v5, %v809_v6 }
 0x230   :  { %v440_v47 = vadd.f32 %v439_v37, %v438_v30  ;;  %v445_v48 = vadd.f32 %v444_v38, %v443_v34  ;;  %v435_v62 = vadd.f32 %v434_v42, %v433_v33  ;;  %v345_v26 = vadd.f32 %v337_v63, %v225_v4 }
 0x231   :  { %v548_v13 = vsel %vm169_vm1, %v504_v44, 0.0  ;;  %v344_v20 = vadd.f32 %v330_v8, %v218_v25  ;;  %v566_v27 = vadd.f32 %v540_v52, %v454_v12  ;;  %v561_v59 = vadd.f32 %v560_v19, %v559_v3 }
 0x232   :  { %v446_v55 = vrot.slane %v445_v48, 2  ;;  %v549_v56 = vrot.slane %v548_v13, 4  ;;  %v441_v0 = vrot.slane %v440_v47, 1  ;;  %v455_v11 = vadd.f32 %v435_v62, %v343_v7 }
 0x233   :  { %v585_v29 = vsel %vm584_vm5, %v566_v27, %v583_v57 }
 0x234   :  { %v447_v1 = vadd.f32 %v446_v55, %v445_v48  ;;  %v550_v22 = vadd.f32 %v549_v56, %v548_v13  ;;  %v442_v49 = vadd.f32 %v441_v0, %v440_v47  ;;  %v567_v23 = vadd.f32 %v547_v16, %v455_v11 }
 0x236   :  { %v448_v9 = vrot.slane %v447_v1, 1  ;;  %v551_v10 = vrot.slane %v550_v22, 2  ;;  %v456_v28 = vadd.f32 %v442_v49, %v344_v20  ;;  %v587_v31 = vsel %vm586_vm6, %v567_v23, %v585_v29 }
 0x238   :  { %v449_v14 = vadd.f32 %v448_v9, %v447_v1  ;;  %v552_v15 = vadd.f32 %v551_v10, %v550_v22 }
 0x23a   :  { %v553_v21 = vrot.slane %v552_v15, 1  ;;  %v457_v24 = vadd.f32 %v449_v14, %v345_v26 }
 0x23c   :  { %v554_v41 = vadd.f32 %v553_v21, %v552_v15  ;;  %v569_v30 = vadd.f32 %v561_v59, %v457_v24 }
 0x23e   :  { %v568_v17 = vadd.f32 %v554_v41, %v456_v28 }
 0x240   :  { %v589_v32 = vsel %vm588_vm7, %v568_v17, %v587_v31 }
 0x241   :  { %v591_v6 = vsel %vm590_vm8, %v569_v30, %v589_v32 }
 0x242   :  { %593 = vst.msk [vmem:[#allocation7] sm:$0xff] %vm169_vm1, %v591_v6 }
 0x243   :  { %673 = shalt.err (!%p670_p0)
}
 0x244   :  { %603 = dma.vmem_to_hbm [thread:$0]  %s601_s1, 128, %s835_s2, [#allocation4]  }
 0x245   :  { %686 = dma.done.wait [#allocation4], 128  }
 0x246   :  { %687 = vsyncadd [#allocation4], 4294967168 }
 0x247   :  { %607 = vsyncpa [#allocation3], 1 }
 0x248   :  { %608 = vsyncpa [#allocation6], 1 }
 0x249   :  { %609 = vsyncpa [#allocation4], 1 }

</bundles_post_ra>
